<compile_context>
chip_gen: v7x
topology: tpu7x:2x2x1
jax: 0.10.0
libtpu: 0.0.40
codegen_flags: <defaults>
</compile_context>

<pallas_src>
import functools
import math

import jax
import jax.numpy as jnp
from jax.experimental import pallas as pl
from jax.experimental.pallas import tpu as pltpu

EPS = 1e-5  # PyTorch F.layer_norm default


def _layernorm_kernel(*refs, dim, groups, has_beta):
    """One (tile_rows, groups*dim) tile. Statistics in f32, per normalization group."""
    refs = list(refs)
    x_ref = refs.pop(0)
    gamma_ref = refs.pop(0)
    beta_ref = refs.pop(0) if has_beta else None
    seg_ref = refs.pop(0) if groups > 1 else None
    o_ref = refs.pop(0)

    x = x_ref[...].astype(jnp.float32)
    gamma = gamma_ref[...].astype(jnp.float32)
    inv_d = jnp.float32(1.0 / dim)

    if groups == 1:
        # Plain per-row reduction over the lane axis (two-pass: matches torch closely).
        mean = jnp.mean(x, axis=-1, keepdims=True)
        xc = x - mean
        var = jnp.mean(jnp.square(xc), axis=-1, keepdims=True)
    else:
        # Lane-dense packed path: each vreg row holds `groups` normalization groups of
        # width `dim`. Per-group sums via the resident block-diagonal ones matrix on
        # the MXU keep everything 2-D and lane-dense (no reshapes / masked stores).
        seg = seg_ref[...]  # (gd, gd) f32, DMA'd once (constant index_map)
        mean = jnp.dot(x, seg, preferred_element_type=jnp.float32) * inv_d
        xc = x - mean
        var = jnp.dot(jnp.square(xc), seg, preferred_element_type=jnp.float32) * inv_d

    inv = jax.lax.rsqrt(var + EPS)
    y = (xc * inv) * gamma              # plain form: 3 full-tile VALU ops (+1 if beta)
    if has_beta:
        y = y + beta_ref[...].astype(jnp.float32)
    o_ref[...] = y.astype(o_ref.dtype)


def _round_down(v, m):
    return (v // m) * m


def _round_up(v, m):
    return -(-v // m) * m


def _vmem_budget():
    """Generation-aware (working-set budget, vmem_limit_bytes, two_tensorcores)."""
    try:
        vmem_cap = int(pltpu.get_tpu_info().vmem_capacity_bytes)
    except Exception:
        vmem_cap = 64 * 1024 * 1024  # conservative fallback (v7x-sized)
    if vmem_cap <= 80 * 1024 * 1024:
        # v7x-class: 64 MiB / TensorCore, 2 TCs per chip. Leave headroom for Mosaic
        # internal scratch and the double-buffered output.
        return 42 * 1024 * 1024, 50 * 1024 * 1024, True
    # v5e / v6e: 128 MiB VMEM, single TensorCore -> use most of the scratchpad.
    budget = int(vmem_cap * 0.70)
    limit = int(min(vmem_cap - 24 * 1024 * 1024, 100 * 1024 * 1024))
    return budget, limit, False


def _choose_tile_rows(rows, lane_dim, itemsize):
    """Largest row tile that fits the per-step VMEM working set (no artificial cap)."""
    budget, vmem_limit, two_cores = _vmem_budget()

    # Per row: 2x double-buffered input + 2x output tiles (input dtype) plus ~4
    # full-tile f32 temporaries live inside the kernel body.
    per_row_bytes = lane_dim * (4 * itemsize + 16)
    pack = {4: 8, 2: 16, 1: 32}.get(itemsize, 8)  # dtype-specific sublane pack

    cap = max(pack, budget // per_row_bytes)
    tile = min(cap, rows)

    if two_cores and rows > 2 * pack:
        # v7x: ensure >= 2 grid steps so both TensorCores get work; prefer an even
        # step count so the "parallel" axis load-balances.
        tile = min(tile, _round_up(pl.cdiv(rows, 2), pack))
        steps = pl.cdiv(rows, tile)
        if steps > 2 and steps % 2 == 1:
            alt = _round_up(pl.cdiv(rows, steps + 1), pack)
            tile = max(pack, min(tile, alt))

    if tile >= rows:
        return rows, vmem_limit  # single full-extent block along rows (always legal)
    return max(pack, _round_down(tile, pack)), vmem_limit


def layer_norm(x, gamma, beta=None):
    """LayerNorm over the last dimension of x (any leading shape).

    `beta=None` skips the bias add entirely (the module's beta is a registered
    all-zeros buffer, so the result is identical and cheaper).
    """
    orig_shape = x.shape
    dim = orig_shape[-1]
    x2 = x.reshape(-1, dim)
    rows = x2.shape[0]
    has_beta = beta is not None

    # Lane-dense packing for narrow dims: pack g rows per vreg row so g*dim is a
    # multiple of 128 (g = 128 / gcd(dim, 128)); a tiny row pad covers rows % g != 0.
    groups = 1
    pad_rows = 0
    if dim < 128:
        groups = 128 // math.gcd(dim, 128)
        pad_rows = (-rows) % groups
        if pad_rows:
            x2 = jnp.pad(x2, ((0, pad_rows), (0, 0)))

    lane_dim = groups * dim
    rows_p = (rows + pad_rows) // groups
    x2 = x2.reshape(rows_p, lane_dim)  # row-major metadata reshape, no data movement

    itemsize = jnp.dtype(x.dtype).itemsize
    tile_rows, vmem_limit = _choose_tile_rows(rows_p, lane_dim, itemsize)
    n_steps = pl.cdiv(rows_p, tile_rows)

    # Deeper input pipelining only for narrow, many-step configurations (short steps
    # expose DMA issue latency; multi-MiB tiles already hide it).
    x_spec_kwargs = {}
    if tile_rows * lane_dim * itemsize < (1 << 20) and n_steps >= 16:
        x_spec_kwargs["pipeline_mode"] = pl.Buffered(3)

    param_spec = pl.BlockSpec((1, lane_dim), lambda i: (0, 0))
    inputs = [x2]
    in_specs = [pl.BlockSpec((tile_rows, lane_dim), lambda i: (i, 0), **x_spec_kwargs)]

    gamma2 = gamma.reshape(1, dim)
    inputs.append(jnp.tile(gamma2, (1, groups)) if groups > 1 else gamma2)
    in_specs.append(param_spec)

    if has_beta:
        beta2 = beta.reshape(1, dim)
        inputs.append(jnp.tile(beta2, (1, groups)) if groups > 1 else beta2)
        in_specs.append(param_spec)

    if groups > 1:
        # Block-diagonal segment-sum ones matrix, built once (hoisted out of the
        # kernel body) and kept resident via a constant index_map.
        seg_i = jax.lax.broadcasted_iota(jnp.int32, (lane_dim, lane_dim), 0) // dim
        seg_j = jax.lax.broadcasted_iota(jnp.int32, (lane_dim, lane_dim), 1) // dim
        inputs.append((seg_i == seg_j).astype(jnp.float32))
        in_specs.append(pl.BlockSpec((lane_dim, lane_dim), lambda i: (0, 0)))

    out = pl.pallas_call(
        functools.partial(
            _layernorm_kernel, dim=dim, groups=groups, has_beta=has_beta
        ),
        out_shape=jax.ShapeDtypeStruct((rows_p, lane_dim), x.dtype),
        grid_spec=pltpu.PrefetchScalarGridSpec(
            num_scalar_prefetch=0,
            grid=(n_steps,),
            in_specs=in_specs,
            out_specs=pl.BlockSpec((tile_rows, lane_dim), lambda i: (i, 0)),
        ),
        compiler_params=pltpu.CompilerParams(
            dimension_semantics=("parallel",),
            vmem_limit_bytes=vmem_limit,
        ),
    )(*inputs)

    out = out.reshape(-1, dim)
    if pad_rows:
        out = out[:rows]
    return out.reshape(orig_shape)


if __name__ == "__main__":
    key = jax.random.PRNGKey(0)
    batch, seq, dim = 2, 8, 32

    x = jax.random.normal(key, (batch, seq, dim), dtype=jnp.float32)

    # Deterministic parameter init matching the module's __init__:
    gamma = jnp.ones((dim,), dtype=jnp.float32)   # nn.Parameter(torch.ones(dim))
    beta = jnp.zeros((dim,), dtype=jnp.float32)   # registered buffer torch.zeros(dim)

    # The module's beta is a known all-zeros buffer -> skip the bias add in-kernel
    # (semantically identical to F.layer_norm(x, (dim,), gamma, beta)).
    y = layer_norm(x, gamma, beta=None)
    jax.block_until_ready(y)

    # Reference check against plain JAX layer norm (includes the zero beta).
    xf = x.astype(jnp.float32)
    mean = jnp.mean(xf, axis=-1, keepdims=True)
    var = jnp.mean((xf - mean) ** 2, axis=-1, keepdims=True)
    y_ref = (xf - mean) / jnp.sqrt(var + EPS) * gamma + beta
    assert jnp.allclose(y, y_ref, atol=1e-5, rtol=1e-5), "mismatch vs reference"

    print("KERNEL_OK")
</pallas_src>

<mosaic_0001>
module attributes {stable_mosaic.version = 11 : i64} {
  func.func @_layernorm_kernel(%arg0: i32, %arg1: memref<4x128xf32, #tpu.memory_space<vmem>>, %arg2: memref<1x128xf32, #tpu.memory_space<vmem>>, %arg3: memref<128x128xf32, #tpu.memory_space<vmem>>, %arg4: memref<4x128xf32, #tpu.memory_space<vmem>>) attributes {dimension_semantics = [#tpu.dimension_semantics<parallel>], iteration_bounds = array<i64: 1>, scalar_prefetch = 0 : i64, scratch_operands = 0 : i64, tpu.core_type = #tpu.core_type<tc>, window_params = [{transform_indices = @transform_0, window_bounds = array<i64: 4, 128>}, {pipeline_mode = #tpu.pipeline_mode<synchronous>, transform_indices = @transform_1, window_bounds = array<i64: 1, 128>}, {pipeline_mode = #tpu.pipeline_mode<synchronous>, transform_indices = @transform_2, window_bounds = array<i64: 128, 128>}, {transform_indices = @transform_3, window_bounds = array<i64: 4, 128>}]} {
    %c0 = arith.constant 0 : index
    %c0_0 = arith.constant 0 : index
    %0 = vector.load %arg1[%c0, %c0_0] : memref<4x128xf32, #tpu.memory_space<vmem>>, vector<4x128xf32>
    %c0_1 = arith.constant 0 : index
    %c0_2 = arith.constant 0 : index
    %1 = vector.load %arg2[%c0_1, %c0_2] : memref<1x128xf32, #tpu.memory_space<vmem>>, vector<1x128xf32>
    %c0_3 = arith.constant 0 : index
    %c0_4 = arith.constant 0 : index
    %2 = vector.load %arg3[%c0_3, %c0_4] : memref<128x128xf32, #tpu.memory_space<vmem>>, vector<128x128xf32>
    %cst = arith.constant dense<0.000000e+00> : vector<4x128xf32>
    %3 = tpu.matmul %0, %2, %cst {dimension_numbers = #tpu.dot_dimension_numbers<[1], [0], [0], [1], [0, 0, 1, 1], [], []>} : vector<4x128xf32>, vector<128x128xf32>, vector<4x128xf32> -> vector<4x128xf32>
    %cst_5 = arith.constant 3.125000e-02 : f32
    %4 = vector.broadcast %cst_5 : f32 to vector<4x128xf32>
    %5 = arith.mulf %3, %4 : vector<4x128xf32>
    %6 = arith.subf %0, %5 : vector<4x128xf32>
    %7 = arith.mulf %6, %6 : vector<4x128xf32>
    %cst_6 = arith.constant dense<0.000000e+00> : vector<4x128xf32>
    %8 = tpu.matmul %7, %2, %cst_6 {dimension_numbers = #tpu.dot_dimension_numbers<[1], [0], [0], [1], [0, 0, 1, 1], [], []>} : vector<4x128xf32>, vector<128x128xf32>, vector<4x128xf32> -> vector<4x128xf32>
    %cst_7 = arith.constant 3.125000e-02 : f32
    %9 = vector.broadcast %cst_7 : f32 to vector<4x128xf32>
    %10 = arith.mulf %8, %9 : vector<4x128xf32>
    %cst_8 = arith.constant 9.99999974E-6 : f32
    %11 = vector.broadcast %cst_8 : f32 to vector<4x128xf32>
    %12 = arith.addf %10, %11 : vector<4x128xf32>
    %13 = math.rsqrt %12 : vector<4x128xf32>
    %14 = arith.mulf %6, %13 : vector<4x128xf32>
    %15 = vector.broadcast %1 : vector<1x128xf32> to vector<4x128xf32>
    %16 = arith.mulf %14, %15 : vector<4x128xf32>
    %c0_9 = arith.constant 0 : index
    %c0_10 = arith.constant 0 : index
    %17 = vector.load %arg4[%c0_9, %c0_10] : memref<4x128xf32, #tpu.memory_space<vmem>>, vector<4x128xf32>
    tpu.vector_store %arg4[%c0_9, %c0_10], %16 {strides = array<i32>} : memref<4x128xf32, #tpu.memory_space<vmem>>, vector<4x128xf32>,
    return
  }
  func.func @transform_0(%arg0: i32) -> (i32, i32) {
    %c0_i32 = arith.constant 0 : i32
    %c0_i32_0 = arith.constant 0 : i32
    return %arg0, %c0_i32 : i32, i32
  }
  func.func @transform_1(%arg0: i32) -> (i32, i32) {
    %c0_i32 = arith.constant 0 : i32
    %c0_i32_0 = arith.constant 0 : i32
    %c0_i32_1 = arith.constant 0 : i32
    return %c0_i32, %c0_i32_0 : i32, i32
  }
  func.func @transform_2(%arg0: i32) -> (i32, i32) {
    %c0_i32 = arith.constant 0 : i32
    %c0_i32_0 = arith.constant 0 : i32
    %c0_i32_1 = arith.constant 0 : i32
    return %c0_i32, %c0_i32_0 : i32, i32
  }
  func.func @transform_3(%arg0: i32) -> (i32, i32) {
    %c0_i32 = arith.constant 0 : i32
    %c0_i32_0 = arith.constant 0 : i32
    return %arg0, %c0_i32 : i32, i32
  }
}

</mosaic_0001>

<bundles_post_ra>
// kernel: tpu_custom_call.1
= control target key start
LH: loop header
LB: loop body
LE: loop exit
PB: predicated region body
PF: predicated region fallthrough
CT: control target
= control target key end

     0   :  { %8 = vsyncpa [#allocation3], 0  ;;  %s539_s0 = inlined_call_operand.hbm [shape: f32[4,128], index: 0, kind: input, shape index: {}]   ;;  %s540_s1 = inlined_call_operand.vmem [shape: f32[1,128], index: 1, kind: input, shape index: {}]   ;;  %s541_s2 = inlined_call_operand.hbm [shape: f32[128,128], index: 2, kind: input, shape index: {}]   ;;  %s542_s3 = inlined_call_operand.hbm [shape: f32[4,128], index: 3, kind: output, shape index: {}]  }
   0x1   :  { %9 = vsyncpa [#allocation6], 0 }
   0x2   :  { %10 = vsyncpa [#allocation4], 0  ;;  %s465_s12 = smov [#allocation2]   ;;  %s466_s14 = smov [#allocation5]  }
   0x3   :  { %s17_s13 = sshll.u32 %s465_s12, 4  ;;  %s28_s15 = sshll.u32 %s466_s14, 4  ;;  %s18_s13 = int_to_ptr.vmem [resolvable:$true] %s17_s13  ;;  %s493_s15 = int_to_ptr.vmem [resolvable:$true] %s28_s15 }
   0x4   :  { %s393_s18 = scalar_lea.hbm %s539_s0, 64 }
   0x5   :  { %p394_p0 = scmp.ne.s32.totalorder %s539_s0, %s393_s18  ;;  %p397_p1 = scmp.lt.u32.totalorder %s393_s18, %s539_s0 }
   0x7   :  { %p399_p2 = pnand %p397_p1, %p394_p0 }
   0x9   :  { %402 = shalt.err (!%p399_p2)
}
   0xa   :  { %s403_s23 = scalar_lea.vmem %s18_s13, 64  ;;  %p408_p4 = scmp.lt.s32.totalorder %s18_s13, %s18_s13 }
   0xb   :  { %p404_p3 = scmp.ne.s32.totalorder %s18_s13, %s403_s23  ;;  %p409_p5 = scmp.lt.s32.totalorder %s403_s23, %s403_s23 }
   0xd   :  { %p410_p6 = por %p409_p5, %p408_p4 }
   0xf   :  { %p411_p7 = pnand %p410_p6, %p404_p3 }
  0x11   :  { %414 = shalt.err (!%p411_p7)
}
  0x12   :  { %20 = dma.hbm_to_vmem [thread:$0]  %s539_s0, 64, %s18_s13, [#allocation3]  }
  0x13   :  { %s415_s28 = scalar_lea.hbm %s541_s2, 2048 }
  0x14   :  { %p416_p8 = scmp.ne.s32.totalorder %s541_s2, %s415_s28  ;;  %p419_p9 = scmp.lt.u32.totalorder %s415_s28, %s541_s2 }
  0x16   :  { %p421_p10 = pnand %p419_p9, %p416_p8 }
  0x18   :  { %424 = shalt.err (!%p421_p10)
}
  0x19   :  { %s425_s6 = scalar_lea.vmem %s493_s15, 2048  ;;  %p430_p12 = scmp.lt.s32.totalorder %s493_s15, %s493_s15 }
  0x1a   :  { %p426_p11 = scmp.ne.s32.totalorder %s493_s15, %s425_s6  ;;  %p431_p13 = scmp.lt.s32.totalorder %s425_s6, %s425_s6 }
  0x1c   :  { %p432_p0 = por %p431_p13, %p430_p12 }
  0x1e   :  { %p433_p1 = pnand %p432_p0, %p426_p11 }
  0x20   :  { %436 = shalt.err (!%p433_p1)
}
  0x21   :  { %s467_s0 = smov 128   ;;  %s468_s7 = smov 8  }
  0x22   :  { %34 = dma.hbm_to_vmem [thread:$0]  %s541_s2, 2048, %s493_s15, [#allocation6], %s467_s0, %s467_s0, %s468_s7  }
  0x23   :  { %459 = dma.done.wait [#allocation3], 64  }
  0x24   :  { %460 = vsyncadd [#allocation3], 4294967232 }
  0x25   :  { %461 = dma.done.wait [#allocation6], 2048  }
  0x26   :  { %462 = vsyncadd [#allocation6], 4294965248  ;;  %v469_v0 = vmov 0.0|0.0   ;;  %vm470_vm0 = vmmov 0   ;;  %v471_v1 = vmov 0.0   ;;  %v43_v2 = vld [vmem:[#allocation5] sm:$0xff] }
  0x27   :  { %335 = vmatprep.subr.bf16.mxu0 %v469_v0  ;;  %297 = vmatprep.mubr.msk.f32.mxu0 %vm470_vm0, %v471_v1  ;;  %v44_v3 = vld [vmem:[#allocation5 + $0x8] sm:$0xff]  ;;  %v45_v4 = vld [vmem:[#allocation5 + $0x10] sm:$0xff]  ;;  %v46_v6 = vld [vmem:[#allocation5 + $0x18] sm:$0xff]  ;;  %s472_s11 = smov [#allocation7]  }
  0x28   :  { %359 = vmatprep.subr.bf16.mxu1 %v469_v0  ;;  %332 = vmatprep.mubr.msk.f32.mxu1 %vm470_vm0, %v471_v1  ;;  %v336_v5 = vpack.c.bf16 %v44_v3, %v43_v2  ;;  %v339_v7 = vpack.c.bf16 %v46_v6, %v45_v4  ;;  %v47_v8 = vld [vmem:[#allocation5 + $0x20] sm:$0xff]  ;;  %v48_v9 = vld [vmem:[#allocation5 + $0x28] sm:$0xff]  ;;  %v49_v11 = vld [vmem:[#allocation5 + $0x30] sm:$0xff]  ;;  %s220_s12 = sshll.u32 %s472_s11, 4  ;;  %s221_s12 = int_to_ptr.vmem [resolvable:$true] %s220_s12 }
  0x29   :  { %v342_v10 = vpack.c.bf16 %v48_v9, %v47_v8  ;;  %v50_v12 = vld [vmem:[#allocation5 + $0x38] sm:$0xff]  ;;  %v51_v14 = vld [vmem:[#allocation5 + $0x40] sm:$0xff]  ;;  %v52_v15 = vld [vmem:[#allocation5 + $0x48] sm:$0xff]  ;;  %s437_s13 = scalar_lea.vmem %s221_s12, 64  ;;  %p442_p3 = scmp.lt.s32.totalorder %s221_s12, %s221_s12 }
  0x2a   :  { %337 = vmatpush3.bf16.msra.mxu0 %v336_v5  ;;  %361 = vmatpush3.bf16.msra.mxu1 %v336_v5  ;;  %v345_v13 = vpack.c.bf16 %v50_v12, %v49_v11  ;;  %v348_v16 = vpack.c.bf16 %v52_v15, %v51_v14  ;;  %v53_v17 = vld [vmem:[#allocation5 + $0x50] sm:$0xff]  ;;  %v54_v18 = vld [vmem:[#allocation5 + $0x58] sm:$0xff]  ;;  %v55_v20 = vld [vmem:[#allocation5 + $0x60] sm:$0xff]  ;;  %p438_p2 = scmp.ne.s32.totalorder %s221_s12, %s437_s13  ;;  %p443_p4 = scmp.lt.s32.totalorder %s437_s13, %s437_s13 }
  0x2b   :  { %338 = vmatprep.subr.bf16.mxu0 %v469_v0  ;;  %362 = vmatprep.subr.bf16.mxu1 %v469_v0  ;;  %v351_v19 = vpack.c.bf16 %v54_v18, %v53_v17  ;;  %v56_v21 = vld [vmem:[#allocation5 + $0x68] sm:$0xff]  ;;  %v57_v23 = vld [vmem:[#allocation5 + $0x70] sm:$0xff]  ;;  %v58_v24 = vld [vmem:[#allocation5 + $0x78] sm:$0xff] }
  0x2c   :  { %v354_v22 = vpack.c.bf16 %v56_v21, %v55_v20  ;;  %v357_v25 = vpack.c.bf16 %v58_v24, %v57_v23  ;;  %v41_v26 = vld [vmem:[#allocation2] sm:$0xf]  ;;  %p444_p5 = por %p443_p4, %p442_p3 }
  0x2d   :  { %v230_v37 = vld [vmem:[%s540_s1] ss:$0 sm:$0xff] }
  0x2e   :  { %340 = vmatpush3.bf16.msra.mxu0 %v339_v7  ;;  %364 = vmatpush3.bf16.msra.mxu1 %v339_v7  ;;  %p445_p6 = pnand %p444_p5, %p438_p2 }
  0x2f   :  { %341 = vmatprep.subr.bf16.mxu0 %v469_v0  ;;  %365 = vmatprep.subr.bf16.mxu1 %v469_v0 }
  0x32   :  { %343 = vmatpush3.bf16.msra.mxu0 %v342_v10  ;;  %367 = vmatpush3.bf16.msra.mxu1 %v342_v10 }
  0x33   :  { %344 = vmatprep.subr.bf16.mxu0 %v469_v0  ;;  %368 = vmatprep.subr.bf16.mxu1 %v469_v0 }
  0x36   :  { %346 = vmatpush3.bf16.msra.mxu0 %v345_v13  ;;  %370 = vmatpush3.bf16.msra.mxu1 %v345_v13 }
  0x37   :  { %347 = vmatprep.subr.bf16.mxu0 %v469_v0  ;;  %371 = vmatprep.subr.bf16.mxu1 %v469_v0 }
  0x3a   :  { %349 = vmatpush3.bf16.msra.mxu0 %v348_v16  ;;  %373 = vmatpush3.bf16.msra.mxu1 %v348_v16 }
  0x3b   :  { %350 = vmatprep.subr.bf16.mxu0 %v469_v0  ;;  %374 = vmatprep.subr.bf16.mxu1 %v469_v0 }
  0x3e   :  { %352 = vmatpush3.bf16.msra.mxu0 %v351_v19  ;;  %376 = vmatpush3.bf16.msra.mxu1 %v351_v19 }
  0x3f   :  { %353 = vmatprep.subr.bf16.mxu0 %v469_v0  ;;  %377 = vmatprep.subr.bf16.mxu1 %v469_v0 }
  0x42   :  { %355 = vmatpush3.bf16.msra.mxu0 %v354_v22  ;;  %379 = vmatpush3.bf16.msra.mxu1 %v354_v22 }
  0x43   :  { %356 = vmatprep.subr.bf16.mxu0 %v469_v0  ;;  %380 = vmatprep.subr.bf16.mxu1 %v469_v0 }
  0x46   :  { %358 = vmatpush3.bf16.msra.mxu0 %v357_v25  ;;  %382 = vmatpush3.bf16.msra.mxu1 %v357_v25 }
  0x49   :  { %298 = vmatmul.mubr.f32.vlgmr.msra.gmra.mrb[0].mxu0 %v41_v26 }
 0x11c   :  { %v125_v27 = vpop.f32.mrb[0].mxu0 }
 0x11d   :  { %v129_v28 = vmul.f32 0.03125, %v125_v27  ;;  %v299_v29 = vpop.f32.mrb[1].mxu0 }
 0x11f   :  { %v130_v30 = vsub.f32 %v41_v26, %v129_v28 }
 0x121   :  { %v131_v31 = vmul.f32 %v130_v30, %v130_v30 }
 0x123   :  { %333 = vmatmul.mubr.f32.vlgmr.msra.gmra.mrb[0].mxu1 %v131_v31 }
 0x1f6   :  { %v198_v32 = vpop.f32.mrb[0].mxu1 }
 0x1f7   :  { %v202_v33 = vmul.f32 0.03125, %v198_v32  ;;  %v334_v34 = vpop.f32.mrb[1].mxu1 }
 0x1f9   :  { %v203_v35 = vadd.f32 1e-05, %v202_v33 }
 0x1fb   :  { %391 = vrsqrt.f32 %v203_v35 }
 0x205   :  { %v392_v36 = vpop.eup %391 }
 0x206   :  { %v205_v38 = vmul.f32 %v392_v36, %v130_v30 }
 0x208   :  { %v212_v39 = vmul.f32 %v230_v37, %v205_v38 }
 0x20a   :  { %213 = vst [vmem:[#allocation7] sm:$0xf] %v212_v39 }
 0x20b   :  { %448 = shalt.err (!%p445_p6)
}
 0x20c   :  { %s449_s16 = scalar_lea.hbm %s542_s3, 64 }
 0x20d   :  { %p450_p7 = scmp.ne.s32.totalorder %s542_s3, %s449_s16  ;;  %p453_p8 = scmp.lt.u32.totalorder %s449_s16, %s542_s3 }
 0x20f   :  { %p455_p9 = pnand %p453_p8, %p450_p7 }
 0x211   :  { %458 = shalt.err (!%p455_p9)
}
 0x212   :  { %223 = dma.vmem_to_hbm [thread:$0]  %s221_s12, 64, %s542_s3, [#allocation4]  }
 0x213   :  { %463 = dma.done.wait [#allocation4], 64  }
 0x214   :  { %464 = vsyncadd [#allocation4], 4294967232 }
 0x215   :  { %227 = vsyncpa [#allocation3], 1 }
 0x216   :  { %228 = vsyncpa [#allocation6], 1 }
 0x217   :  { %229 = vsyncpa [#allocation4], 1 }

</bundles_post_ra>
